<compile_context>
chip_gen: v6e
topology: v6e:2x2x1
jax: 0.10.0
libtpu: 0.0.40
codegen_flags: <defaults>
</compile_context>

<pallas_src>
import jax
import jax.numpy as jnp
from jax.experimental import pallas as pl
from jax.experimental.pallas import tpu as pltpu


def _h_sigmoid_kernel(x_ref, o_ref):
    # relu6(x + 3) / 6 == clip(x + 3, 0, 6) / 6.
    # Compute in f32: free (kernel is DMA-bound), tightens bf16 rounding.
    x = x_ref[...].astype(jnp.float32)
    o_ref[...] = (jnp.clip(x + 3.0, 0.0, 6.0) / 6.0).astype(o_ref.dtype)


def _tile_budget():
    """(target_tile_bytes, vmem_limit_bytes) chosen per TPU generation."""
    try:
        vmem = pltpu.get_tpu_info().vmem_capacity_bytes
    except Exception:
        vmem = 64 * 1024 * 1024  # conservative (v7x-like) fallback
    if vmem >= 100 * 1024 * 1024:          # v5e / v6e: 128 MiB VMEM
        return 4 * 1024 * 1024, 64 * 1024 * 1024
    return 2 * 1024 * 1024, 32 * 1024 * 1024  # v7x: 64 MiB VMEM per TC


def _run_tiled(slab, orig_dtype, min_sub, target_tile_bytes, vmem_limit):
    """Main streaming path: (rows, lanes) slab, lanes a multiple of 128."""
    rows, lanes = slab.shape
    itemsize = jnp.dtype(orig_dtype).itemsize
    tgt_rows = max(min_sub,
                   (target_tile_bytes // (lanes * itemsize)) // min_sub * min_sub)
    block_rows = min(rows, tgt_rows)
    grid = (pl.cdiv(rows, block_rows),)
    return pl.pallas_call(
        _h_sigmoid_kernel,
        out_shape=jax.ShapeDtypeStruct((rows, lanes), orig_dtype),
        grid_spec=pl.GridSpec(
            grid=grid,
            in_specs=[pl.BlockSpec((block_rows, lanes), lambda i: (i, 0))],
            out_specs=pl.BlockSpec((block_rows, lanes), lambda i: (i, 0)),
        ),
        compiler_params=pltpu.CompilerParams(
            dimension_semantics=("parallel",),
            vmem_limit_bytes=vmem_limit,
        ),
    )(slab)


def _run_small(flat, orig_dtype, min_sub):
    """Tiny remainder path (< min_sub*512 elements): one padded block."""
    m = flat.shape[0]
    lanes = 128 * pl.cdiv(pl.cdiv(m, min_sub), 128)
    padded = min_sub * lanes
    slab = jnp.pad(flat, (0, padded - m)).reshape(min_sub, lanes)
    out = pl.pallas_call(
        _h_sigmoid_kernel,
        out_shape=jax.ShapeDtypeStruct((min_sub, lanes), orig_dtype),
        grid_spec=pl.GridSpec(
            grid=(1,),
            in_specs=[pl.BlockSpec((min_sub, lanes), lambda i: (i, 0))],
            out_specs=pl.BlockSpec((min_sub, lanes), lambda i: (i, 0)),
        ),
    )(slab)
    return out.reshape(-1)[:m]


def h_sigmoid(x):
    """Elementwise hard-sigmoid, matching the PyTorch module's forward."""
    orig_shape = x.shape
    orig_dtype = x.dtype
    n = x.size
    if n == 0:
        return x

    itemsize = jnp.dtype(orig_dtype).itemsize
    # Minimum sublane packing per dtype: 8 (f32), 16 (bf16/f16), 32 (int8/fp8).
    min_sub = {4: 8, 2: 16, 1: 32}.get(itemsize, 8)
    target_tile_bytes, vmem_limit = _tile_budget()

    # Pick a wide, lane-dense slab layout without padding if possible.
    lanes = None
    for cand in (1024, 512, 256, 128):
        if n % cand == 0:
            r = n // cand
            # Either rows align to sublane packing, or the whole array is a
            # single block (block_shape == full array dims is always legal).
            if r % min_sub == 0 or r * cand * itemsize <= target_tile_bytes:
                lanes = cand
                break

    # ravel/reshape of a contiguous default-layout array is a bitcast (no copy).
    flat = jnp.ravel(x)

    if lanes is not None:
        out = _run_tiled(flat.reshape(n // lanes, lanes), orig_dtype, min_sub,
                         target_tile_bytes, vmem_limit)
        return out.reshape(orig_shape)

    # Ragged element count: stream the aligned prefix through the main kernel,
    # and handle only the tiny tail with a padded single-block call (no
    # whole-tensor pad/slice copies).
    lanes = 512
    chunk = min_sub * lanes
    n_main = (n // chunk) * chunk
    if n_main == 0:
        out = _run_small(flat, orig_dtype, min_sub)
        return out.reshape(orig_shape)

    main_out = _run_tiled(flat[:n_main].reshape(n_main // lanes, lanes),
                          orig_dtype, min_sub, target_tile_bytes, vmem_limit)
    tail_out = _run_small(flat[n_main:], orig_dtype, min_sub)
    out = jnp.concatenate([main_out.reshape(-1), tail_out])
    return out.reshape(orig_shape)


def _ref(x):
    return jnp.clip(x + 3.0, 0.0, 6.0) / 6.0


if __name__ == "__main__":
    key = jax.random.PRNGKey(0)

    # Primary test: NCHW input matching the PyTorch conv convention.
    x = jax.random.normal(key, (2, 4, 16, 16), dtype=jnp.float32) * 4.0
    y = jax.block_until_ready(h_sigmoid(x))
    assert y.shape == x.shape and y.dtype == x.dtype
    assert jnp.allclose(y, _ref(x), atol=1e-6), "mismatch vs reference (f32)"

    # Tiny ragged size (exercises the single-block small path).
    x2 = jax.random.normal(jax.random.PRNGKey(1), (3, 5, 7), dtype=jnp.float32) * 4.0
    y2 = jax.block_until_ready(h_sigmoid(x2))
    assert y2.shape == x2.shape
    assert jnp.allclose(y2, _ref(x2), atol=1e-6), "mismatch vs reference (tiny ragged)"

    # Larger ragged size (exercises aligned-prefix + small-tail path).
    x4 = jax.random.normal(jax.random.PRNGKey(3), (5, 1000, 3), dtype=jnp.float32) * 4.0
    y4 = jax.block_until_ready(h_sigmoid(x4))
    assert y4.shape == x4.shape
    assert jnp.allclose(y4, _ref(x4), atol=1e-6), "mismatch vs reference (large ragged)"

    # bf16 input (exercises the 16-sublane tiling path and f32 internal math).
    x3 = (jax.random.normal(jax.random.PRNGKey(2), (2, 4, 16, 16)) * 4.0).astype(jnp.bfloat16)
    y3 = jax.block_until_ready(h_sigmoid(x3))
    assert y3.dtype == jnp.bfloat16
    assert jnp.allclose(y3.astype(jnp.float32),
                        _ref(x3).astype(jnp.float32), atol=1e-2), "mismatch (bf16)"

    # Multi-block stream (exercises grid > 1 pipelining on every generation).
    x5 = jax.random.normal(jax.random.PRNGKey(4), (512, 4, 32, 32), dtype=jnp.float32)
    y5 = jax.block_until_ready(h_sigmoid(x5))
    assert jnp.allclose(y5, _ref(x5), atol=1e-6), "mismatch vs reference (multi-block)"

    print("KERNEL_OK")
</pallas_src>

<mosaic_0001>
module attributes {stable_mosaic.version = 11 : i64} {
  func.func @_h_sigmoid_kernel(%arg0: i32, %arg1: memref<2x1024xf32, #tpu.memory_space<vmem>>, %arg2: memref<2x1024xf32, #tpu.memory_space<vmem>>) attributes {dimension_semantics = [#tpu.dimension_semantics<parallel>], iteration_bounds = array<i64: 1>, scalar_prefetch = 0 : i64, scratch_operands = 0 : i64, tpu.core_type = #tpu.core_type<tc>, window_params = [{transform_indices = @transform_0, window_bounds = array<i64: 2, 1024>}, {transform_indices = @transform_1, window_bounds = array<i64: 2, 1024>}]} {
    %c0 = arith.constant 0 : index
    %c0_0 = arith.constant 0 : index
    %0 = vector.load %arg1[%c0, %c0_0] : memref<2x1024xf32, #tpu.memory_space<vmem>>, vector<2x1024xf32>
    %cst = arith.constant 3.000000e+00 : f32
    %1 = vector.broadcast %cst : f32 to vector<2x1024xf32>
    %2 = arith.addf %0, %1 : vector<2x1024xf32>
    %cst_1 = arith.constant 0.000000e+00 : f32
    %cst_2 = arith.constant 6.000000e+00 : f32
    %3 = vector.broadcast %cst_1 : f32 to vector<2x1024xf32>
    %4 = arith.maximumf %3, %2 : vector<2x1024xf32>
    %5 = vector.broadcast %cst_2 : f32 to vector<2x1024xf32>
    %6 = arith.minimumf %5, %4 : vector<2x1024xf32>
    %cst_3 = arith.constant 6.000000e+00 : f32
    %7 = vector.broadcast %cst_3 : f32 to vector<2x1024xf32>
    %8 = arith.divf %6, %7 : vector<2x1024xf32>
    %c0_4 = arith.constant 0 : index
    %c0_5 = arith.constant 0 : index
    %9 = vector.load %arg2[%c0_4, %c0_5] : memref<2x1024xf32, #tpu.memory_space<vmem>>, vector<2x1024xf32>
    tpu.vector_store %arg2[%c0_4, %c0_5], %8 {strides = array<i32>} : memref<2x1024xf32, #tpu.memory_space<vmem>>, vector<2x1024xf32>,
    return
  }
  func.func @transform_0(%arg0: i32) -> (i32, i32) {
    %c0_i32 = arith.constant 0 : i32
    %c0_i32_0 = arith.constant 0 : i32
    return %arg0, %c0_i32 : i32, i32
  }
  func.func @transform_1(%arg0: i32) -> (i32, i32) {
    %c0_i32 = arith.constant 0 : i32
    %c0_i32_0 = arith.constant 0 : i32
    return %arg0, %c0_i32 : i32, i32
  }
}

</mosaic_0001>

<bundles_post_ra>
// kernel: tpu_custom_call.1
= control target key start
LH: loop header
LB: loop body
LE: loop exit
PB: predicated region body
PF: predicated region fallthrough
CT: control target
= control target key end

     0   :  { %6 = vsyncpa [#allocation3], 0  ;;  %s113_s0 = inlined_call_operand.hbm [shape: f32[2,1024], index: 0, kind: input, shape index: {}]   ;;  %s114_s1 = inlined_call_operand.hbm [shape: f32[2,1024], index: 1, kind: output, shape index: {}]  }
   0x1   :  { %7 = vsyncpa [#allocation4], 0  ;;  %s95_s6 = smov [#allocation2]  }
   0x2   :  { %s14_s7 = sshll.u32 %s95_s6, 4  ;;  %s15_s7 = int_to_ptr.vmem [resolvable:$true] %s14_s7 }
   0x3   :  { %s59_s8 = scalar_lea.vmem %s15_s7, 256  ;;  %p64_p1 = scmp.lt.s32.totalorder %s15_s7, %s15_s7 }
   0x4   :  { %p60_p0 = scmp.ne.s32.totalorder %s15_s7, %s59_s8  ;;  %p65_p2 = scmp.lt.s32.totalorder %s59_s8, %s59_s8 }
   0x6   :  { %p66_p3 = por %p65_p2, %p64_p1 }
   0x8   :  { %p67_p4 = pnand %p66_p3, %p60_p0 }
   0xa   :  { %70 = shalt.err (!%p67_p4)
}
   0xb   :  { %17 = dma.hbm_to_vmem [thread:$0]  %s113_s0, 256, %s15_s7, [#allocation3]  }
   0xc   :  { %91 = dma.done.wait [#allocation3], 256  }
   0xd   :  { %92 = vsyncadd [#allocation3], 4294967040  ;;  %v21_v0 = vld [vmem:[#allocation2] sm:$0xff]  ;;  %v22_v1 = vld [vmem:[#allocation2 + $0x8] sm:$0xff]  ;;  %s96_s11 = smov [#allocation5]  }
   0xe   :  { %v23_v2 = vadd.f32 3.0, %v21_v0  ;;  %v24_v3 = vadd.f32 3.0, %v22_v1  ;;  %s40_s12 = sshll.u32 %s96_s11, 4  ;;  %s41_s12 = int_to_ptr.vmem [resolvable:$true] %s40_s12 }
   0xf   :  { %s71_s13 = scalar_lea.vmem %s41_s12, 256  ;;  %p76_p6 = scmp.lt.s32.totalorder %s41_s12, %s41_s12 }
  0x10   :  { %v25_v4 = vmax.f32 %v23_v2, 0.0  ;;  %v26_v5 = vmax.f32 %v24_v3, 0.0  ;;  %p72_p5 = scmp.ne.s32.totalorder %s41_s12, %s71_s13  ;;  %p77_p7 = scmp.lt.s32.totalorder %s71_s13, %s71_s13 }
  0x12   :  { %v27_v6 = vmin.f32 %v25_v4, 6.0  ;;  %v28_v7 = vmin.f32 %v26_v5, 6.0  ;;  %p78_p8 = por %p77_p7, %p76_p6 }
  0x14   :  { %v30_v8 = vmul.f32 0.16666667, %v27_v6  ;;  %v31_v9 = vmul.f32 0.16666667, %v28_v7  ;;  %p79_p9 = pnand %p78_p8, %p72_p5 }
  0x16   :  { %32 = vst [vmem:[#allocation5] sm:$0xff] %v30_v8  ;;  %33 = vst [vmem:[#allocation5 + $0x8] sm:$0xff] %v31_v9 }
  0x17   :  { %82 = shalt.err (!%p79_p9)
}
  0x18   :  { %43 = dma.vmem_to_hbm [thread:$0]  %s41_s12, 256, %s114_s1, [#allocation4]  }
  0x19   :  { %93 = dma.done.wait [#allocation4], 256  }
  0x1a   :  { %94 = vsyncadd [#allocation4], 4294967040 }
  0x1b   :  { %47 = vsyncpa [#allocation3], 1 }
  0x1c   :  { %48 = vsyncpa [#allocation4], 1 }

</bundles_post_ra>
